<compile_context>
chip_gen: v7x
topology: tpu7x:2x2x1
jax: 0.10.0
libtpu: 0.0.40
codegen_flags: <defaults>
</compile_context>

<pallas_src>
import math
import functools

import jax
import jax.numpy as jnp
from jax.experimental import pallas as pl
from jax.experimental.pallas import tpu as pltpu


def _round_up(v, m):
    return (v + m - 1) // m * m


def _ipow(x, n):
    """Integer power with a static non-negative exponent (unrolled muls)."""
    if n == 0:
        return jnp.ones_like(x)
    r = x
    for _ in range(n - 1):
        r = r * x
    return r


def _matmul_kernel(x_ref, w_ref, o_ref, acc_ref):
    """Inference path: plain x @ w with a K-reduction accumulator."""
    k_id = pl.program_id(2)
    k_last = pl.num_programs(2) - 1

    @pl.when(k_id == 0)
    def _():
        acc_ref[...] = jnp.zeros_like(acc_ref)

    acc_ref[...] += jnp.dot(x_ref[...], w_ref[...],
                            preferred_element_type=jnp.float32)

    @pl.when(k_id == k_last)
    def _():
        o_ref[...] = acc_ref[...].astype(o_ref.dtype)


def _lsoftmax_kernel(tgt_ref, x_ref, w_ref, wnsq_ref, xnsq_ref, o_ref, acc_ref,
                     *, margin, beta):
    """Training path: matmul accumulation + large-margin epilogue at k==last."""
    k_id = pl.program_id(2)
    k_last = pl.num_programs(2) - 1
    # NOTE: all Pallas-specific primitives (program_id) are bound OUTSIDE the
    # pl.when bodies; the epilogue only closes over their values.
    col_base = pl.program_id(1) * o_ref.shape[1]

    @pl.when(k_id == 0)
    def _():
        acc_ref[...] = jnp.zeros_like(acc_ref)

    # bf16 x / w tiles -> f32 accumulation on the MXU.
    acc_ref[...] += jnp.dot(x_ref[...], w_ref[...],
                            preferred_element_type=jnp.float32)

    @pl.when(k_id == k_last)
    def _():
        logit = acc_ref[...]                                    # [tm, tn] f32
        tm, tn = logit.shape

        # Target mask for this class tile (no one-hot input needed).
        tgt = tgt_ref[...]                                      # [tm, 1] int32
        col = jax.lax.broadcasted_iota(jnp.int32, (tm, tn), 1) + col_base
        mask = col == tgt                                       # [tm, tn] bool
        maskf = mask.astype(jnp.float32)

        # Rows whose target lives in another class tile get an all-False mask
        # and pass through unchanged via the final select.
        logit_target = jnp.sum(logit * maskf, axis=1, keepdims=True)   # [tm,1]
        w_t_nsq = jnp.sum(wnsq_ref[...] * maskf, axis=1, keepdims=True)
        wx_norm = jnp.sqrt(w_t_nsq * xnsq_ref[...])             # ||w_t||*||x||

        # cos(theta) = logit_target / (||w_t||*||x|| + 1e-10)
        cos_theta = logit_target / (wx_norm + 1e-10)            # [tm, 1]

        # cos(m*theta) via the binomial expansion (all on [tm,1] vectors).
        sin2 = 1.0 - cos_theta * cos_theta
        cos_m = jnp.zeros_like(cos_theta)
        for n in range(margin // 2 + 1):
            sign = 1.0 if (n % 2 == 0) else -1.0
            coeff = float(math.comb(margin, 2 * n))
            cos_m = cos_m + (sign * coeff
                             * _ipow(cos_theta, margin - 2 * n)
                             * _ipow(sin2, n))

        # k = floor(acos(clamp(cos)) / (pi/m)) without acos:
        # count thresholds cos_c <= cos(j*pi/m); track (-1)^k alongside.
        eps = 1e-7
        cos_c = jnp.clip(cos_theta, -1.0 + eps, 1.0 - eps)
        kf = jnp.zeros_like(cos_theta)
        sign_k = jnp.ones_like(cos_theta)
        for j in range(1, margin + 1):
            cond = (cos_c <= math.cos(j * math.pi / margin)).astype(jnp.float32)
            kf = kf + cond
            sign_k = sign_k * (1.0 - 2.0 * cond)

        updated = wx_norm * (sign_k * cos_m - 2.0 * kf)
        blended = (updated + beta * logit_target) * (1.0 / (1.0 + beta))

        # Single select instead of logit*(1-t) + t*blended.
        o_ref[...] = jnp.where(mask, blended, logit).astype(o_ref.dtype)


def lsoftmax_linear(x, w, target=None, *, margin=4, beta=100.0, beta_min=0.0):
    """Forward pass of LSoftmaxLinear (training branch when target is given)."""
    B, D = x.shape
    Dw, C = w.shape
    assert D == Dw
    x = x.astype(jnp.float32)
    w = w.astype(jnp.float32)

    # Tile sizes: 128-wide lane-dense class / reduction tiles (friendly on
    # v5e / v6e / v7x); batch tile = 8-aligned full batch when small.
    tn = 128
    tk = 128
    tm = 128 if B >= 128 else _round_up(max(B, 8), 8)
    Bp, Dp, Cp = _round_up(B, tm), _round_up(D, tk), _round_up(C, tn)

    # Zero-pad to tile multiples; pads contribute nothing to dots / norms.
    xp = jnp.zeros((Bp, Dp), jnp.float32).at[:B, :D].set(x)
    wp = jnp.zeros((Dp, Cp), jnp.float32).at[:D, :C].set(w)
    xb = xp.astype(jnp.bfloat16)
    wb = wp.astype(jnp.bfloat16)

    grid = (Bp // tm, Cp // tn, Dp // tk)
    cparams = pltpu.CompilerParams(
        dimension_semantics=("parallel", "parallel", "arbitrary"),
        vmem_limit_bytes=32 * 1024 * 1024,   # conservative for v7x's 64 MiB VMEM
    )

    if target is None:
        out = pl.pallas_call(
            _matmul_kernel,
            out_shape=jax.ShapeDtypeStruct((Bp, Cp), jnp.float32),
            grid=grid,
            in_specs=[pl.BlockSpec((tm, tk), lambda i, j, k: (i, k)),
                      pl.BlockSpec((tk, tn), lambda i, j, k: (k, j))],
            out_specs=pl.BlockSpec((tm, tn), lambda i, j, k: (i, j)),
            scratch_shapes=[pltpu.VMEM((tm, tn), jnp.float32)],
            compiler_params=cparams,
        )(xb, wb)
        return out[:B, :C]

    beta_eff = float(max(beta, beta_min))

    # Hoisted tiny precomputes (O(B*D + D*C) vs the O(B*D*C) matmul), kept in
    # f32 for accurate norms; targets as a narrow [B,1] int32 stream instead of
    # a [B,C] one-hot (removes a whole input DMA stream).
    x_nsq = jnp.sum(xp * xp, axis=1, keepdims=True)        # [Bp, 1] f32
    w_nsq = jnp.sum(wp * wp, axis=0, keepdims=True)        # [1, Cp] f32
    tgt = jnp.zeros((Bp, 1), jnp.int32).at[:B, 0].set(target.astype(jnp.int32))

    out = pl.pallas_call(
        functools.partial(_lsoftmax_kernel, margin=margin, beta=beta_eff),
        out_shape=jax.ShapeDtypeStruct((Bp, Cp), jnp.float32),
        grid=grid,
        in_specs=[pl.BlockSpec((tm, 1), lambda i, j, k: (i, 0)),    # targets
                  pl.BlockSpec((tm, tk), lambda i, j, k: (i, k)),   # x (bf16)
                  pl.BlockSpec((tk, tn), lambda i, j, k: (k, j)),   # w (bf16)
                  pl.BlockSpec((1, tn), lambda i, j, k: (0, j)),    # ||w_c||^2
                  pl.BlockSpec((tm, 1), lambda i, j, k: (i, 0))],   # ||x_r||^2
        out_specs=pl.BlockSpec((tm, tn), lambda i, j, k: (i, j)),
        scratch_shapes=[pltpu.VMEM((tm, tn), jnp.float32)],
        compiler_params=cparams,
    )(tgt, xb, wb, w_nsq, x_nsq)
    return out[:B, :C]


def _reference(x, w, target, margin, beta):
    """Pure-JAX reference mirroring the PyTorch module math (logit matmul done
    with the same bf16-in / f32-accumulate MXU convention as the kernel)."""
    logit = jnp.dot(x.astype(jnp.bfloat16), w.astype(jnp.bfloat16),
                    preferred_element_type=jnp.float32)
    idx = jnp.arange(x.shape[0])
    logit_target = logit[idx, target]
    w_target_norm = jnp.linalg.norm(w[:, target], axis=0)
    x_norm = jnp.linalg.norm(x, axis=1)
    cos = logit_target / (w_target_norm * x_norm + 1e-10)

    sin2 = 1.0 - cos ** 2
    cos_m = jnp.zeros_like(cos)
    for n in range(margin // 2 + 1):
        sign = 1.0 if n % 2 == 0 else -1.0
        cos_m = cos_m + sign * math.comb(margin, 2 * n) \
            * cos ** (margin - 2 * n) * sin2 ** n

    eps = 1e-7
    acos = jnp.arccos(jnp.clip(cos, -1.0 + eps, 1.0 - eps))
    k = jnp.floor(acos / (math.pi / margin))
    sign_k = 1.0 - 2.0 * jnp.mod(k, 2.0)
    updated = w_target_norm * x_norm * (sign_k * cos_m - 2.0 * k)
    blended = (updated + beta * logit_target) / (1.0 + beta)
    return logit.at[idx, target].set(blended)


if __name__ == "__main__":
    # Small but tiling-exercising config: 3 K-steps, 2 class tiles (with
    # padding), single batch tile.
    input_features, output_features, margin = 300, 200, 4
    batch = 24

    key = jax.random.PRNGKey(0)
    kx, kw, kt = jax.random.split(key, 3)

    x = jax.random.normal(kx, (batch, input_features), dtype=jnp.float32)
    # kaiming_normal_ on weight.t() ([out, in]): std = sqrt(2 / fan_in)
    w = jax.random.normal(kw, (input_features, output_features),
                          dtype=jnp.float32) * math.sqrt(2.0 / input_features)
    target = jax.random.randint(kt, (batch,), 0, output_features)

    # Training branch (target given).
    out = jax.block_until_ready(
        lsoftmax_linear(x, w, target, margin=margin, beta=100.0))

    # Inference branch (target=None) — tiled matmul kernel.
    out_inf = jax.block_until_ready(lsoftmax_linear(x, w, None, margin=margin))

    # Checks against pure-JAX references of the PyTorch math.
    ref = _reference(x, w, target, margin, 100.0)
    ref_inf = jnp.dot(x.astype(jnp.bfloat16), w.astype(jnp.bfloat16),
                      preferred_element_type=jnp.float32)
    assert jnp.allclose(out, ref, atol=5e-3, rtol=5e-3), "lsoftmax mismatch"
    assert jnp.allclose(out_inf, ref_inf, atol=1e-3, rtol=1e-3), "matmul mismatch"

    # TODO(synk): the PyTorch module's `self.beta *= self.scale` decay is host-
    # side training state; it stays outside the kernel (pass beta per call).
    print("KERNEL_OK")
</pallas_src>

<mosaic_0001>
module attributes {stable_mosaic.version = 11 : i64} {
  func.func @_lsoftmax_kernel(%arg0: i32, %arg1: i32, %arg2: i32, %arg3: memref<24x1xi32, #tpu.memory_space<vmem>>, %arg4: memref<24x128xbf16, #tpu.memory_space<vmem>>, %arg5: memref<128x128xbf16, #tpu.memory_space<vmem>>, %arg6: memref<1x128xf32, #tpu.memory_space<vmem>>, %arg7: memref<24x1xf32, #tpu.memory_space<vmem>>, %arg8: memref<24x128xf32, #tpu.memory_space<vmem>>, %arg9: memref<24x128xf32, #tpu.memory_space<vmem>>) attributes {dimension_semantics = [#tpu.dimension_semantics<parallel>, #tpu.dimension_semantics<parallel>, #tpu.dimension_semantics<arbitrary>], iteration_bounds = array<i64: 1, 2, 3>, scalar_prefetch = 0 : i64, scratch_operands = 1 : i64, tpu.core_type = #tpu.core_type<tc>, window_params = [{transform_indices = @transform_0, window_bounds = array<i64: 24, 1>}, {transform_indices = @transform_1, window_bounds = array<i64: 24, 128>}, {transform_indices = @transform_2, window_bounds = array<i64: 128, 128>}, {transform_indices = @transform_3, window_bounds = array<i64: 1, 128>}, {transform_indices = @transform_4, window_bounds = array<i64: 24, 1>}, {transform_indices = @transform_5, window_bounds = array<i64: 24, 128>}]} {
    %c128_i32 = arith.constant 128 : i32
    %0 = arith.muli %arg1, %c128_i32 : i32
    %c0_i32 = arith.constant 0 : i32
    %1 = arith.cmpi eq, %arg2, %c0_i32 : i32
    %2 = arith.extui %1 : i1 to i32
    %c0_i32_0 = arith.constant 0 : i32
    %3 = arith.cmpi ne, %2, %c0_i32_0 : i32
    scf.if %3 {
      %cst_9 = arith.constant 0.000000e+00 : f32
      %13 = vector.broadcast %cst_9 : f32 to vector<24x128xf32>
      %c0_10 = arith.constant 0 : index
      %c0_11 = arith.constant 0 : index
      %14 = vector.load %arg9[%c0_10, %c0_11] : memref<24x128xf32, #tpu.memory_space<vmem>>, vector<24x128xf32>
      tpu.vector_store %arg9[%c0_10, %c0_11], %13 {strides = array<i32>} : memref<24x128xf32, #tpu.memory_space<vmem>>, vector<24x128xf32>,
    } else {
    }
    %c0 = arith.constant 0 : index
    %c0_1 = arith.constant 0 : index
    %4 = vector.load %arg9[%c0, %c0_1] : memref<24x128xf32, #tpu.memory_space<vmem>>, vector<24x128xf32>
    %c0_2 = arith.constant 0 : index
    %c0_3 = arith.constant 0 : index
    %5 = vector.load %arg4[%c0_2, %c0_3] : memref<24x128xbf16, #tpu.memory_space<vmem>>, vector<24x128xbf16>
    %c0_4 = arith.constant 0 : index
    %c0_5 = arith.constant 0 : index
    %6 = vector.load %arg5[%c0_4, %c0_5] : memref<128x128xbf16, #tpu.memory_space<vmem>>, vector<128x128xbf16>
    %cst = arith.constant dense<0.000000e+00> : vector<24x128xf32>
    %7 = tpu.matmul %5, %6, %cst {dimension_numbers = #tpu.dot_dimension_numbers<[1], [0], [0], [1], [0, 0, 1, 1], [], []>} : vector<24x128xbf16>, vector<128x128xbf16>, vector<24x128xf32> -> vector<24x128xf32>
    %8 = arith.addf %4, %7 : vector<24x128xf32>
    %c0_6 = arith.constant 0 : index
    %c0_7 = arith.constant 0 : index
    %9 = vector.load %arg9[%c0_6, %c0_7] : memref<24x128xf32, #tpu.memory_space<vmem>>, vector<24x128xf32>
    tpu.vector_store %arg9[%c0_6, %c0_7], %8 {strides = array<i32>} : memref<24x128xf32, #tpu.memory_space<vmem>>, vector<24x128xf32>,
    %c2_i32 = arith.constant 2 : i32
    %10 = arith.cmpi eq, %arg2, %c2_i32 : i32
    %11 = arith.extui %10 : i1 to i32
    %c0_i32_8 = arith.constant 0 : i32
    %12 = arith.cmpi ne, %11, %c0_i32_8 : i32
    scf.if %12 {
      %c0_9 = arith.constant 0 : index
      %c0_10 = arith.constant 0 : index
      %13 = vector.load %arg9[%c0_9, %c0_10] : memref<24x128xf32, #tpu.memory_space<vmem>>, vector<24x128xf32>
      %c0_11 = arith.constant 0 : index
      %c0_12 = arith.constant 0 : index
      %14 = vector.load %arg3[%c0_11, %c0_12] : memref<24x1xi32, #tpu.memory_space<vmem>>, vector<24x1xi32>
      %15 = tpu.iota {dimensions = array<i32: 1>} : vector<24x128xi32>
      %16 = vector.broadcast %0 : i32 to vector<24x128xi32>
      %17 = arith.addi %15, %16 : vector<24x128xi32>
      %18 = vector.broadcast %14 : vector<24x1xi32> to vector<24x128xi32>
      %19 = arith.cmpi eq, %17, %18 : vector<24x128xi32>
      %20 = arith.extui %19 : vector<24x128xi1> to vector<24x128xi32>
      %21 = arith.sitofp %20 : vector<24x128xi32> to vector<24x128xf32>
      %22 = arith.mulf %13, %21 : vector<24x128xf32>
      %cst_13 = arith.constant dense<0.000000e+00> : vector<24xf32>
      %23 = vector.multi_reduction <add>, %22, %cst_13 [1] : vector<24x128xf32> to vector<24xf32>
      %24 = vector.shape_cast %23 : vector<24xf32> to vector<24x1xf32>
      %c0_14 = arith.constant 0 : index
      %c0_15 = arith.constant 0 : index
      %25 = vector.load %arg6[%c0_14, %c0_15] : memref<1x128xf32, #tpu.memory_space<vmem>>, vector<1x128xf32>
      %26 = vector.broadcast %25 : vector<1x128xf32> to vector<24x128xf32>
      %27 = arith.mulf %26, %21 : vector<24x128xf32>
      %cst_16 = arith.constant dense<0.000000e+00> : vector<24xf32>
      %28 = vector.multi_reduction <add>, %27, %cst_16 [1] : vector<24x128xf32> to vector<24xf32>
      %29 = vector.shape_cast %28 : vector<24xf32> to vector<24x1xf32>
      %c0_17 = arith.constant 0 : index
      %c0_18 = arith.constant 0 : index
      %30 = vector.load %arg7[%c0_17, %c0_18] : memref<24x1xf32, #tpu.memory_space<vmem>>, vector<24x1xf32>
      %31 = arith.mulf %29, %30 : vector<24x1xf32>
      %32 = math.sqrt %31 : vector<24x1xf32>
      %cst_19 = arith.constant 1.000000e-10 : f32
      %33 = vector.broadcast %cst_19 : f32 to vector<24x1xf32>
      %34 = arith.addf %32, %33 : vector<24x1xf32>
      %35 = arith.divf %24, %34 : vector<24x1xf32>
      %36 = arith.mulf %35, %35 : vector<24x1xf32>
      %cst_20 = arith.constant 1.000000e+00 : f32
      %37 = vector.broadcast %cst_20 : f32 to vector<24x1xf32>
      %38 = arith.subf %37, %36 : vector<24x1xf32>
      %cst_21 = arith.constant 0.000000e+00 : f32
      %39 = vector.broadcast %cst_21 : f32 to vector<24x1xf32>
      %40 = arith.mulf %35, %35 : vector<24x1xf32>
      %41 = arith.mulf %40, %35 : vector<24x1xf32>
      %42 = arith.mulf %41, %35 : vector<24x1xf32>
      %cst_22 = arith.constant 1.000000e+00 : f32
      %43 = vector.broadcast %cst_22 : f32 to vector<24x1xf32>
      %44 = arith.mulf %43, %42 : vector<24x1xf32>
      %cst_23 = arith.constant 1.000000e+00 : f32
      %45 = vector.broadcast %cst_23 : f32 to vector<24x1xf32>
      %46 = arith.mulf %44, %45 : vector<24x1xf32>
      %47 = arith.addf %39, %46 : vector<24x1xf32>
      %48 = arith.mulf %35, %35 : vector<24x1xf32>
      %cst_24 = arith.constant -6.000000e+00 : f32
      %49 = vector.broadcast %cst_24 : f32 to vector<24x1xf32>
      %50 = arith.mulf %49, %48 : vector<24x1xf32>
      %51 = arith.mulf %50, %38 : vector<24x1xf32>
      %52 = arith.addf %47, %51 : vector<24x1xf32>
      %cst_25 = arith.constant 1.000000e+00 : f32
      %53 = vector.broadcast %cst_25 : f32 to vector<24x1xf32>
      %cst_26 = arith.constant 1.000000e+00 : f32
      %54 = vector.broadcast %cst_26 : f32 to vector<24x1xf32>
      %55 = arith.mulf %54, %53 : vector<24x1xf32>
      %56 = arith.mulf %38, %38 : vector<24x1xf32>
      %57 = arith.mulf %55, %56 : vector<24x1xf32>
      %58 = arith.addf %52, %57 : vector<24x1xf32>
      %cst_27 = arith.constant -0.99999988 : f32
      %cst_28 = arith.constant 0.99999988 : f32
      %59 = vector.broadcast %cst_27 : f32 to vector<24x1xf32>
      %60 = arith.maximumf %59, %35 : vector<24x1xf32>
      %61 = vector.broadcast %cst_28 : f32 to vector<24x1xf32>
      %62 = arith.minimumf %61, %60 : vector<24x1xf32>
      %cst_29 = arith.constant 0.000000e+00 : f32
      %63 = vector.broadcast %cst_29 : f32 to vector<24x1xf32>
      %cst_30 = arith.constant 1.000000e+00 : f32
      %64 = vector.broadcast %cst_30 : f32 to vector<24x1xf32>
      %cst_31 = arith.constant 0.707106769 : f32
      %65 = vector.broadcast %cst_31 : f32 to vector<24x1xf32>
      %66 = arith.cmpf ole, %62, %65 : vector<24x1xf32>
      %67 = arith.extui %66 : vector<24x1xi1> to vector<24x1xi32>
      %68 = arith.sitofp %67 : vector<24x1xi32> to vector<24x1xf32>
      %69 = arith.addf %63, %68 : vector<24x1xf32>
      %cst_32 = arith.constant 2.000000e+00 : f32
      %70 = vector.broadcast %cst_32 : f32 to vector<24x1xf32>
      %71 = arith.mulf %70, %68 : vector<24x1xf32>
      %cst_33 = arith.constant 1.000000e+00 : f32
      %72 = vector.broadcast %cst_33 : f32 to vector<24x1xf32>
      %73 = arith.subf %72, %71 : vector<24x1xf32>
      %74 = arith.mulf %64, %73 : vector<24x1xf32>
      %cst_34 = arith.constant 6.12323426E-17 : f32
      %75 = vector.broadcast %cst_34 : f32 to vector<24x1xf32>
      %76 = arith.cmpf ole, %62, %75 : vector<24x1xf32>
      %77 = arith.extui %76 : vector<24x1xi1> to vector<24x1xi32>
      %78 = arith.sitofp %77 : vector<24x1xi32> to vector<24x1xf32>
      %79 = arith.addf %69, %78 : vector<24x1xf32>
      %cst_35 = arith.constant 2.000000e+00 : f32
      %80 = vector.broadcast %cst_35 : f32 to vector<24x1xf32>
      %81 = arith.mulf %80, %78 : vector<24x1xf32>
      %cst_36 = arith.constant 1.000000e+00 : f32
      %82 = vector.broadcast %cst_36 : f32 to vector<24x1xf32>
      %83 = arith.subf %82, %81 : vector<24x1xf32>
      %84 = arith.mulf %74, %83 : vector<24x1xf32>
      %cst_37 = arith.constant -0.707106769 : f32
      %85 = vector.broadcast %cst_37 : f32 to vector<24x1xf32>
      %86 = arith.cmpf ole, %62, %85 : vector<24x1xf32>
      %87 = arith.extui %86 : vector<24x1xi1> to vector<24x1xi32>
      %88 = arith.sitofp %87 : vector<24x1xi32> to vector<24x1xf32>
      %89 = arith.addf %79, %88 : vector<24x1xf32>
      %cst_38 = arith.constant 2.000000e+00 : f32
      %90 = vector.broadcast %cst_38 : f32 to vector<24x1xf32>
      %91 = arith.mulf %90, %88 : vector<24x1xf32>
      %cst_39 = arith.constant 1.000000e+00 : f32
      %92 = vector.broadcast %cst_39 : f32 to vector<24x1xf32>
      %93 = arith.subf %92, %91 : vector<24x1xf32>
      %94 = arith.mulf %84, %93 : vector<24x1xf32>
      %cst_40 = arith.constant -1.000000e+00 : f32
      %95 = vector.broadcast %cst_40 : f32 to vector<24x1xf32>
      %96 = arith.cmpf ole, %62, %95 : vector<24x1xf32>
      %97 = arith.extui %96 : vector<24x1xi1> to vector<24x1xi32>
      %98 = arith.sitofp %97 : vector<24x1xi32> to vector<24x1xf32>
      %99 = arith.addf %89, %98 : vector<24x1xf32>
      %cst_41 = arith.constant 2.000000e+00 : f32
      %100 = vector.broadcast %cst_41 : f32 to vector<24x1xf32>
      %101 = arith.mulf %100, %98 : vector<24x1xf32>
      %cst_42 = arith.constant 1.000000e+00 : f32
      %102 = vector.broadcast %cst_42 : f32 to vector<24x1xf32>
      %103 = arith.subf %102, %101 : vector<24x1xf32>
      %104 = arith.mulf %94, %103 : vector<24x1xf32>
      %105 = arith.mulf %104, %58 : vector<24x1xf32>
      %cst_43 = arith.constant 2.000000e+00 : f32
      %106 = vector.broadcast %cst_43 : f32 to vector<24x1xf32>
      %107 = arith.mulf %106, %99 : vector<24x1xf32>
      %108 = arith.subf %105, %107 : vector<24x1xf32>
      %109 = arith.mulf %32, %108 : vector<24x1xf32>
      %cst_44 = arith.constant 1.000000e+02 : f32
      %110 = vector.broadcast %cst_44 : f32 to vector<24x1xf32>
      %111 = arith.mulf %110, %24 : vector<24x1xf32>
      %112 = arith.addf %109, %111 : vector<24x1xf32>
      %cst_45 = arith.constant 9.900990e-03 : f32
      %113 = vector.broadcast %cst_45 : f32 to vector<24x1xf32>
      %114 = arith.mulf %112, %113 : vector<24x1xf32>
      %115 = vector.shape_cast %114 : vector<24x1xf32> to vector<24x1xf32>
      %116 = vector.broadcast %115 : vector<24x1xf32> to vector<24x128xf32>
      %117 = arith.select %19, %116, %13 : vector<24x128xi1>, vector<24x128xf32>
      %c0_46 = arith.constant 0 : index
      %c0_47 = arith.constant 0 : index
      %118 = vector.load %arg8[%c0_46, %c0_47] : memref<24x128xf32, #tpu.memory_space<vmem>>, vector<24x128xf32>
      tpu.vector_store %arg8[%c0_46, %c0_47], %117 {strides = array<i32>} : memref<24x128xf32, #tpu.memory_space<vmem>>, vector<24x128xf32>,
    } else {
    }
    return
  }
  func.func @transform_0(%arg0: i32, %arg1: i32, %arg2: i32) -> (i32, i32) {
    %c0_i32 = arith.constant 0 : i32
    %c0_i32_0 = arith.constant 0 : i32
    return %arg0, %c0_i32 : i32, i32
  }
  func.func @transform_1(%arg0: i32, %arg1: i32, %arg2: i32) -> (i32, i32) {
    %c0_i32 = arith.constant 0 : i32
    return %arg0, %arg2 : i32, i32
  }
  func.func @transform_2(%arg0: i32, %arg1: i32, %arg2: i32) -> (i32, i32) {
    %c0_i32 = arith.constant 0 : i32
    return %arg2, %arg1 : i32, i32
  }
  func.func @transform_3(%arg0: i32, %arg1: i32, %arg2: i32) -> (i32, i32) {
    %c0_i32 = arith.constant 0 : i32
    %c0_i32_0 = arith.constant 0 : i32
    return %c0_i32, %arg1 : i32, i32
  }
  func.func @transform_4(%arg0: i32, %arg1: i32, %arg2: i32) -> (i32, i32) {
    %c0_i32 = arith.constant 0 : i32
    %c0_i32_0 = arith.constant 0 : i32
    return %arg0, %c0_i32 : i32, i32
  }
  func.func @transform_5(%arg0: i32, %arg1: i32, %arg2: i32) -> (i32, i32) {
    %c0_i32 = arith.constant 0 : i32
    return %arg0, %arg1 : i32, i32
  }
}

</mosaic_0001>

<bundles_post_ra>
// kernel: tpu_custom_call.1
= control target key start
LH: loop header
LB: loop body
LE: loop exit
PB: predicated region body
PF: predicated region fallthrough
CT: control target
= control target key end

     0   :  { %s1807_s0 = inlined_call_operand.vmem [shape: s32[24,1], index: 0, kind: input, shape index: {}]   ;;  %s1808_s1 = inlined_call_operand.vmem [shape: bf16[24,384], index: 1, kind: input, shape index: {}]   ;;  %s1809_s2 = inlined_call_operand.hbm [shape: bf16[384,256], index: 2, kind: input, shape index: {}]   ;;  %s1810_s3 = inlined_call_operand.vmem [shape: f32[1,256], index: 3, kind: input, shape index: {}]   ;;  %s1811_s4 = inlined_call_operand.vmem [shape: f32[24,1], index: 4, kind: input, shape index: {}]   ;;  %s1812_s5 = inlined_call_operand.hbm [shape: f32[24,256], index: 5, kind: output, shape index: {}]  }
   0x1   :  { %1819 = sst [smem:[#allocation17_spill]] %s1812_s5 }
   0x2   :  { %10 = vsyncpa [#allocation5], 0 }
   0x3   :  { %12 = vsyncpa [#allocation5 + $0x1], 0 }
   0x4   :  { %13 = vsyncpa [#allocation6], 0 }
   0x5   :  { %15 = vsyncpa [#allocation6 + $0x1], 0  ;;  %s1401_s18 = smov 0   ;;  %s1403_s19 = smov 0  }
   0x6   :  { %s1405_s20 = smov 0   ;;  %s1407_s21 = smov 0  }
   0x7   :  { %s1409_s22 = smov 0   ;;  %s1411_s23 = smov 0  }
   0x8   :  { %s1413_s24 = smov 0   ;;  %s1415_s25 = smov 0  }
   0x9   :  { %s1417_s26 = smov 0   ;;  %s1419_s27 = smov 0  }
   0xa   :  { %s1421_s28 = smov 0   ;;  %s1423_s29 = smov 0  }
   0xb   :  { %s1425_s30 = smov 0  }
   0xc LB: > { %1820 = sst [smem:[#allocation10_spill]] %s1318_s20  ;;  %s964_s6 = sadd.s32 4294967295, %s1358_s30   ;;  %s1358_s30 = sphi %s1425_s30, %s21_s30   ;;  %s1354_s29 = sphi %s1423_s29, %s1852_s29   ;;  %s1350_s28 = sphi %s1421_s28, %s1851_s28   ;;  %s1346_s27 = sphi %s1419_s27, %s1850_s27   ;;  %s1342_s26 = sphi %s1417_s26, %s1849_s26   ;;  %s1338_s25 = sphi %s1415_s25, %s1841_s25   ;;  %s1334_s24 = sphi %s1413_s24, %s1840_s24   ;;  %s1330_s23 = sphi %s1411_s23, %s1848_s23   ;;  %s1326_s22 = sphi %s1409_s22, %s1847_s22   ;;  %s1322_s21 = sphi %s1407_s21, %s1846_s21   ;;  %s1318_s20 = sphi %s1405_s20, %s1838_s20   ;;  %s1314_s19 = sphi %s1403_s19, %s1845_s19   ;;  %s1310_s18 = sphi %s1401_s18, %s1844_s18  }
   0xd   : > { %1821 = sst [smem:[#allocation11_spill]] %s1338_s25  ;;  %s33_s8 = sadd.s32 1, %s1350_s28 }
   0xe   : > { %s36_s9 = sadd.s32 1, %s1354_s29  ;;  %p34_p0 = scmp.ge.s32.totalorder %s33_s8, 3 }
   0xf   : > { %s75_s10 = sadd.s32 1, %s1338_s25  ;;  %p82_p1 = scmp.ne.s32.totalorder %s1338_s25, %s1334_s24 }
  0x10   : > { %p83_p2 = scmp.eq.s32.totalorder %s1358_s30, 0  ;;  %s1854_s8 = smov (%p34_p0, %s33_s8), 0 }
  0x11   : > { %1822 = sst [smem:[#allocation12_spill]] %s1854_s8  ;;  %s1856_s9 = smov (!%p34_p0, %s36_s9), %s1354_s29 }
  0x12   : > { %s71_s11 = ssub.s32 %s1350_s28, %s1854_s8  ;;  %p1479_p3 = por %p83_p2, %p82_p1 }
  0x13   : > { %p38_p4 = scmp.ge.s32.totalorder %s1856_s9, 2  ;;  %p73_p5 = scmp.eq.s32.totalorder %s71_s11, 0 }
  0x14   : > { %s103_s13 = sadd.s32 1, %s1330_s23  ;;  %p110_p6 = scmp.ne.s32.totalorder %s1330_s23, %s1326_s22 }
  0x15   : > { %s1858_s9 = smov (%p38_p4, %s1856_s9), 0  ;;  %p116_p8 = scmp.ne.s32.totalorder %s1326_s22, %s1322_s21 }
  0x16   : > { %1824 = sst [smem:[#allocation13_spill]] %s1858_s9  ;;  %s99_s15 = ssub.s32 %s1354_s29, %s1858_s9 }
  0x17   : > { %s1489_s14 = scalar_select %p73_p5, %s1338_s25, %s75_s10  }
  0x18   : > { %p1493_p7 = por %p110_p6, %p83_p2  ;;  %s100_s17 = sor.u32 %s99_s15, %s71_s11 }
  0x19   : > { %1825 = sst [smem:[#allocation14_spill]] %s1489_s14  ;;  %p101_p9 = scmp.eq.s32.totalorder %s100_s17, 0 }
  0x1a   : > { %p117_p10 = scmp.eq.s32.totalorder %s964_s6, 0  ;;  %p181_p11 = scmp.eq.s32.totalorder %s99_s15, 0 }
  0x1b   : > { %s183_s7 = sadd.s32 1, %s1318_s20  ;;  %p193_p13 = scmp.ne.s32.totalorder %s1318_s20, %s1314_s19 }
  0x1c   : > { %s1503_s8 = scalar_select %p101_p9, %s1330_s23, %s103_s13  }
  0x1d   : > { %p1505_p12 = por %p117_p10, %p116_p8  ;;  %p194_p0 = scmp.eq.s32.totalorder %s964_s6, 5 }
  0x1e   : > { %1827 = sst [smem:[#allocation15_spill]] %s1503_s8  ;;  %p199_p1 = scmp.ne.s32.totalorder %s1314_s19, %s1310_s18 }
  0x1f   : > { %s1512_s10 = scalar_select %p181_p11, %s1318_s20, %s183_s7  }
  0x20   : > { %s1830_s9 = sadd.s32 4294967294, %s1358_s30   ;;  %p1520_p4 = por %p194_p0, %p193_p13 }
  0x21   : > { %1829 = sst [smem:[#allocation16_spill]] %s1512_s10  ;;  %p200_p2 = scmp.eq.s32.totalorder %s1830_s9, 5 }
  0x22   : > { %s1831_s21 = scalar_select %p1520_p4, 1, 0 }
  0x23   : > { %p1524_p5 = por %p200_p2, %p199_p1  ;;  %p969_p6 = scmp.ge.s32.totalorder %s1358_s30, 6 }
  0x25   : > { %s1832_s11 = scalar_select %p1524_p5, 1, 0 }
  0x26   : > { %234 = sbr.rel (%p969_p6) target bundleno = 80 (0x50), region = 24 }
  0x2d   : > { %237 = sbr.rel (!%p1479_p3) target bundleno = 52 (0x34), region = 28  ;;  %s239_s6 = sand.u32 (%p1479_p3), 1, %s1338_s25  }
  0x2e   : > { %s970_s7 = sshll.u32 (%p1479_p3), %s1350_s28, 2  ;;  %s1043_s13 = smul.u32 (%p1479_p3), 12, %s239_s6 }
  0x2f   : > { %s246_s17 = scalar_lea.vmem (%p1479_p3), %s1808_s1, %s970_s7 }
  0x30   : > { %v262_v0 = vld [vmem:[%s246_s17] sm:$0xf] (%p1479_p3)  ;;  %v264_v1 = vld [vmem:[%s246_s17 + $0xc] sm:$0xf] (%p1479_p3)  ;;  %v266_v2 = vld [vmem:[%s246_s17 + $0x18] sm:$0xf] (%p1479_p3) }
  0x31   : > { %s241_s14 = scalar_lea.vmem (%p1479_p3), [#allocation3], %s1043_s13 }
  0x32   : > { %263 = vst [vmem:[%s241_s14] sm:$0xf] (%p1479_p3), %v262_v0  ;;  %265 = vst [vmem:[%s241_s14 + $0x4] sm:$0xf] (%p1479_p3), %v264_v1 }
  0x33   : > { %267 = vst [vmem:[%s241_s14 + $0x8] sm:$0xf] (%p1479_p3), %v266_v2 }
  0x34 PF: > { %s297_s12 = sand.u32 1, %s1330_s23   ;;  %s1012_s25 = sshll.u32 %s1350_s28, 5 }
  0x35   : > { %s971_s8 = sshll.u32 %s297_s12, 6  ;;  %s307_s6 = sadd.s32 %s1354_s29, %s1012_s25 }
  0x36   : > { %s974_s10 = sshll.u32 %s307_s6, 6  ;;  %s301_s20 = scalar_lea.vmem [#allocation4], %s971_s8 }
  0x37   : > { %s310_s9 = sshll.u32 %s301_s20, 4  ;;  %s1542_s17 = scalar_lea.hbm %s1809_s2, %s974_s10  ;;  %s1544_s9 = int_to_ptr.vmem [resolvable:$true] %s310_s9 }
  0x38   : > { %s1546_s14 = scalar_lea.sflag [#allocation5], %s297_s12  ;;  %s1192_s13 = scalar_lea.hbm %s1542_s17, 1024 }
  0x39   : > { %p1193_p3 = scmp.ne.s32.totalorder %s1542_s17, %s1192_s13  ;;  %s1196_s8 = scalar_lea.hbm %s1809_s2, 6144 }
  0x3a   : > { %p1197_p10 = scmp.lt.u32.totalorder %s1542_s17, %s1809_s2  ;;  %p1198_p11 = scmp.lt.u32.totalorder %s1196_s8, %s1192_s13 }
  0x3b   : > { %p1194_p8 = pnand %p1193_p3, %p1493_p7  ;;  %p1200_p0 = scmp.lt.u32.totalorder %s1192_s13, %s1542_s17 }
  0x3c   : > { %p1199_p13 = por %p1198_p11, %p1197_p10 }
  0x3d   : > { %p1195_p9 = pneg %p1194_p8 }
  0x3e   : > { %p1201_p1 = por %p1200_p0, %p1199_p13 }
  0x40   : > { %p1202_p2 = pnand %p1201_p1, %p1195_p9 }
  0x42   : > { %1205 = shalt.err (!%p1202_p2)
}
  0x43   : > { %s1206_s12 = scalar_lea.vmem %s1544_s9, 1024  ;;  %s1360_s7 = smov [#allocation4]  }
  0x44   : > { %p1207_p6 = scmp.ne.s32.totalorder %s1544_s9, %s1206_s12  ;;  %s1210_s15 = sshll.u32 %s1360_s7, 4  ;;  %s1211_s15 = int_to_ptr.vmem [resolvable:$false] %s1210_s15 }
  0x45   : > { %s1212_s25 = scalar_lea.vmem %s1211_s15, 2048  ;;  %p1213_p5 = scmp.lt.s32.totalorder %s1544_s9, %s1211_s15 }
  0x46   : > { %p1208_p3 = pnand %p1207_p6, %p1493_p7  ;;  %p1214_p4 = scmp.lt.s32.totalorder %s1212_s25, %s1206_s12 }
  0x48   : > { %p1209_p8 = pneg %p1208_p3  ;;  %p1215_p10 = por %p1214_p4, %p1213_p5 }
  0x4a   : > { %p1216_p11 = pnand %p1215_p10, %p1209_p8 }
  0x4c   : > { %1219 = shalt.err (!%p1216_p11)
}
  0x4d   : > { %s1361_s13 = smov 128   ;;  %s1362_s20 = smov 64  }
  0x4e   : > { %s1363_s8 = smov 4  }
  0x4f   : > { %1046 = dma.hbm_to_vmem [thread:$0]  (%p1493_p7), %s1542_s17, 1024, %s1544_s9, %s1546_s14, %s1361_s13, %s1362_s20, %s1363_s8  }
  0x50 PF: > { %p975_p9 = scmp.ge.s32.totalorder %s1358_s30, 1  ;;  %p324_p13 = scmp.lt.s32.totalorder %s1358_s30, 7 }
  0x52   : > { %p325_p0 = pnand %p975_p9, %p324_p13 }
  0x53   : > { %s331_s6 = sand.u32 (!%p325_p0), 1, %s1334_s24   ;;  %s337_s10 = sand.u32 (!%p325_p0), 1, %s1326_s22  }
  0x54   : > { %328 = sbr.rel (%p325_p0) target bundleno = 710 (0x2c6), region = 77  ;;  %s976_s7 = sshll.u32 (!%p325_p0), %s337_s10, 6 }
  0x55   : > { %s1574_s12 = smul.u32 (!%p325_p0), 12, %s331_s6  ;;  %s338_s25 = scalar_lea.sflag (!%p325_p0), [#allocation5], %s337_s10 }
  0x56   : > { %s1577_s16 = scalar_lea.vmem (!%p325_p0), [#allocation4], %s976_s7 }
  0x57   : > { %s333_s15 = scalar_lea.vmem (!%p325_p0), [#allocation3], %s1574_s12 }
  0x5b   : > { %1301 = dma.done.wait (%p1505_p12), %s338_s25, 1024  }
  0x5c   : > { %1303 = vsyncadd (%p1505_p12), %s338_s25, 4294966272  ;;  %s382_s24 = sand.u32 1, %s1314_s19   ;;  %p393_p7 = scmp.lt.s32.totalorder %s1346_s27, 1 }
  0x5d   : > { %s1045_s9 = smul.u32 24, %s382_s24  ;;  %s977_s17 = sshll.u32 %s1346_s27, 7 }
  0x5e   : > { %s1589_s14 = scalar_select %p393_p7, %s1346_s27, 1 }
  0x5f   : > { %s1595_s6 = scalar_lea.vmem [#allocation7], %s1045_s9  ;;  %p978_p12 = scmp.ne.s32.totalorder %s1342_s26, 0 }
  0x60   : > { %s395_s8 = scalar_lea.vmem %s1810_s3, %s1589_s14  ;;  %v1364_v3 = vmov (!%p978_p12), 0.0  }
  0x61   : > { %408 = sbr.rel (%p978_p12) target bundleno = 104 (0x68), region = 89  ;;  %409 = vst [vmem:[#allocation2] sm:$0xff] (!%p978_p12), %v1364_v3  ;;  %410 = vst [vmem:[#allocation2 + $0x8] sm:$0xff] (!%p978_p12), %v1364_v3 }
  0x62   : > { %411 = vst [vmem:[#allocation2 + $0x10] sm:$0xff] (!%p978_p12), %v1364_v3 }
  0x68 PF: > { %v1168_v4 = vld [vmem:[%s1577_s16] sm:$0xff]   ;;  %v1169_v5 = vld [vmem:[%s1577_s16 + $0x8] sm:$0xff]   ;;  %v1170_v6 = vld [vmem:[%s1577_s16 + $0x10] sm:$0xff]   ;;  %p989_p4 = scmp.ne.s32.totalorder %s1342_s26, 2 }
  0x69   : > { %1023 = vmatprep.subr.bf16.mxu0 %v1168_v4  ;;  %v1171_v7 = vld [vmem:[%s1577_s16 + $0x18] sm:$0xff]   ;;  %v1172_v9 = vld [vmem:[%s1577_s16 + $0x20] sm:$0xff]   ;;  %v1173_v10 = vld [vmem:[%s1577_s16 + $0x28] sm:$0xff]   ;;  %v1365_v26 = vmov (!%p989_p4), 0   ;;  %v556_v28 = vlaneseq (!%p989_p4)  ;;  %v558_v30 = vstv (!%p989_p4), %s977_s17  ;;  %v1366_v35 = vmov (!%p989_p4), 0.0  }
  0x6a   : > { %1024 = vmatpush3.bf16.msra.mxu0 %v1168_v4  ;;  %v1176_v8 = vld [vmem:[%s333_s15] sm:$0xff]   ;;  %v1177_v13 = vld [vmem:[%s333_s15 + $0x8] ss:$0 sps:$4 sm:$0xff]   ;;  %v414_v14 = vld [vmem:[#allocation2 + $0x10] sm:$0xff]  ;;  %1178 = vset.pattern.permute.xlu0 (!%p989_p4), %v1365_v26 }
  0x6b   : > { %1025 = vmatprep.subr.bf16.mxu0 %v1169_v5  ;;  %1039 = vmatprep.mubr.bf16.mxu0 %v1176_v8  ;;  %v1174_v11 = vld [vmem:[%s1577_s16 + $0x30] sm:$0xff]   ;;  %v1175_v12 = vld [vmem:[%s1577_s16 + $0x38] sm:$0xff]   ;;  %v555_v25 = vld [vmem:[%s1807_s0 + $0x10] sm:$0xff] (!%p989_p4)  ;;  %v557_v29 = vand.u32 (!%p989_p4), 127, %v556_v28 }
  0x6c   : > { %v412_v15 = vld [vmem:[#allocation2] sm:$0xff]  ;;  %v413_v19 = vld [vmem:[#allocation2 + $0x8] sm:$0xff]  ;;  %1179 = vset.pattern.permute.xlu1 (!%p989_p4), %v1365_v26  ;;  %v605_v55 = vld [vmem:[%s1811_s4 + $0x10] sm:$0xff] (!%p989_p4) }
  0x6d   : > { %v553_v24 = vld [vmem:[%s1807_s0] sm:$0xff] (!%p989_p4)  ;;  %567 = vperm.xlu1 (!%p989_p4), %1179, %v555_v25   ;;  %v554_v27 = vld [vmem:[%s1807_s0 + $0x8] sm:$0xff] (!%p989_p4)  ;;  %v1622_v31 = vadd.s32 (!%p989_p4), %v558_v30, %v557_v29 }
  0x6e   : > { %1026 = vmatpush3.bf16.msra.mxu0 %v1169_v5  ;;  %561 = vperm.xlu0 (!%p989_p4), %1178, %v553_v24   ;;  %v993_v33 = vld [vmem:[%s395_s8] ss:$0 sm:$0xff] (!%p989_p4)  ;;  %v604_v52 = vld [vmem:[%s1811_s4 + $0x8] sm:$0xff] (!%p989_p4) }
  0x6f   : > { %1027 = vmatprep.subr.bf16.mxu0 %v1170_v6  ;;  %v603_v49 = vld [vmem:[%s1811_s4] sm:$0xff] (!%p989_p4) }
  0x72   : > { %1028 = vmatpush3.bf16.msra.mxu0 %v1170_v6  ;;  %564 = vperm.xlu0 (!%p989_p4), %1178, %v554_v27  }
  0x73   : > { %1029 = vmatprep.subr.bf16.mxu0 %v1171_v7 }
  0x76   : > { %1030 = vmatpush3.bf16.msra.mxu0 %v1171_v7 }
  0x77   : > { %1031 = vmatprep.subr.bf16.mxu0 %v1172_v9 }
  0x7a   : > { %1032 = vmatpush3.bf16.msra.mxu0 %v1172_v9 }
  0x7b   : > { %1033 = vmatprep.subr.bf16.mxu0 %v1173_v10 }
  0x7e   : > { %1034 = vmatpush3.bf16.msra.mxu0 %v1173_v10 }
  0x7f   : > { %1035 = vmatprep.subr.bf16.mxu0 %v1174_v11 }
  0x82   : > { %1036 = vmatpush3.bf16.msra.mxu0 %v1174_v11 }
  0x83   : > { %1037 = vmatprep.subr.bf16.mxu0 %v1175_v12 }
  0x86   : > { %1038 = vmatpush3.bf16.msra.mxu0 %v1175_v12 }
  0x89   : > { %1040 = vmatmul.mubr.bf16.vlgmr.msra.gmra.mrb[0].mxu0 %v1177_v13 }
  0xec   : > { %v1631_v34 = vpop.permute.xlu1 (!%p989_p4), %567 }
  0xed   : > { %v1624_v32 = vpop.permute.xlu0 (!%p989_p4), %561  ;;  %vm571_vm1 = vcmp.eq.s32.totalorder (!%p989_p4), %v1622_v31, %v1631_v34 }
  0xee   : > { %vm569_vm0 = vcmp.eq.s32.totalorder (!%p989_p4), %v1622_v31, %v1624_v32  ;;  %v992_v41 = vsel (!%p989_p4), %vm571_vm1, 1.0, %v1366_v35 }
  0xef   : > { %v990_v36 = vsel (!%p989_p4), %vm569_vm0, 1.0, %v1366_v35  ;;  %v596_v45 = vmul.f32 (!%p989_p4), %v993_v33, %v992_v41 }
  0xf0   : > { %v594_v37 = vmul.f32 (!%p989_p4), %v993_v33, %v990_v36 }
  0xf1   : > { %v1641_v38 = vpop.permute.xlu0 (!%p989_p4), %564 }
  0xf2   : > { %vm570_vm2 = vcmp.eq.s32.totalorder (!%p989_p4), %v1622_v31, %v1641_v38  ;;  %597 = vadd.xlane.f32.xlu1 (!%p989_p4), %v594_v37 }
  0xf3   : > { %v991_v40 = vsel (!%p989_p4), %vm570_vm2, 1.0, %v1366_v35 }
  0xf4   : > { %v595_v43 = vmul.f32 (!%p989_p4), %v993_v33, %v991_v40 }
  0xf6   : > { %599 = vadd.xlane.f32.xlu0 (!%p989_p4), %v595_v43 }
  0xfa   : > { %601 = vadd.xlane.f32.xlu0 (!%p989_p4), %v596_v45 }
 0x15c   : > { %v1041_v16 = vpop.f32.mrb[0].mxu0  ;;  %549 = sbr.rel (%p989_p4) target bundleno = 682 (0x2aa), region = 93 }
 0x15d   : > { %v542_v17 = vadd.f32 %v1041_v16, %v414_v14  ;;  %v526_v18 = vpop.f32.mrb[1].mxu0 }
 0x15e   : > { %v540_v20 = vadd.f32 %v526_v18, %v412_v15  ;;  %v1042_v21 = vpop.f32.mrb[2].mxu0 }
 0x15f   : > { %545 = vst [vmem:[#allocation2 + $0x10] sm:$0xff] %v542_v17  ;;  %v529_v22 = vpop.f32.mrb[3].mxu0 }
 0x160   : > { %543 = vst [vmem:[#allocation2] sm:$0xff] %v540_v20  ;;  %v541_v23 = vadd.f32 %v529_v22, %v413_v19 }
 0x162   : > { %544 = vst [vmem:[#allocation2 + $0x8] sm:$0xff] %v541_v23 }
 0x166   : > { %v1655_v42 = vld [vmem:[#allocation2 + $0x10] sm:$0xff] }
 0x167   : > { %v1643_v39 = vld [vmem:[#allocation2] sm:$0xff]  ;;  %v580_v46 = vmul.f32 %v992_v41, %v1655_v42 }
 0x168   : > { %v578_v44 = vmul.f32 %v990_v36, %v1643_v39 }
 0x169   : > { %v1659_v47 = vld [vmem:[#allocation2 + $0x8] sm:$0xff] }
 0x16a   : > { %581 = vadd.xlane.f32.xlu1 %v578_v44  ;;  %v579_v48 = vmul.f32 %v991_v40, %v1659_v47 }
 0x16c   : > { %583 = vadd.xlane.f32.xlu0 %v579_v48 }
 0x16e   : > { %585 = vadd.xlane.f32.xlu1 %v580_v46 }
 0x17f   : > { %v598_v50 = vpop.xlane.xlu1 %597 }
 0x180   : > { %v606_v51 = vmul.f32 %v603_v49, %v598_v50 }
 0x182   : > { %1180 = vrsqrt.f32 %v606_v51  ;;  %vm611_vm3 = vcmp.eq.f32.partialorder %v606_v51, inf  ;;  %v614_v60 = vand.u32 2147483648, %v606_v51  ;;  %vm613_vm4 = vcmp.eq.f32.partialorder %v606_v51, 0.0 }
 0x183   : > { %v600_v53 = vpop.xlane.xlu0 %599 }
 0x184   : > { %v607_v54 = vmul.f32 %v604_v52, %v600_v53 }
 0x186   : > { %1182 = vrsqrt.f32 %v607_v54  ;;  %vm618_vm5 = vcmp.eq.f32.partialorder %v607_v54, inf  ;;  %v621_v2 = vand.u32 2147483648, %v607_v54  ;;  %vm620_vm6 = vcmp.eq.f32.partialorder %v607_v54, 0.0 }
 0x187   : > { %v602_v56 = vpop.xlane.xlu0 %601 }
 0x188   : > { %v608_v57 = vmul.f32 %v605_v55, %v602_v56 }
 0x18a   : > { %1184 = vrsqrt.f32 %v608_v57  ;;  %vm625_vm7 = vcmp.eq.f32.partialorder %v608_v57, inf  ;;  %v628_v8 = vand.u32 2147483648, %v608_v57  ;;  %vm627_vm8 = vcmp.eq.f32.partialorder %v608_v57, 0.0 }
 0x18c   : > { %v1181_v58 = vpop.eup %1180 }
 0x18d   : > { %v610_v59 = vmul.f32 %v1181_v58, %v606_v51 }
 0x18f   : > { %v612_v61 = vsel %vm611_vm3, %v606_v51, %v610_v59 }
 0x190   : > { %v1183_v62 = vpop.eup %1182  ;;  %v1671_v63 = vsel %vm613_vm4, %v614_v60, %v612_v61 }
 0x191   : > { %v630_v0 = vadd.f32 1e-10, %v1671_v63  ;;  %v617_v1 = vmul.f32 %v1183_v62, %v607_v54 }
 0x193   : > { %1186 = vrcp.f32 %v630_v0  ;;  %v619_v3 = vsel %vm618_vm5, %v607_v54, %v617_v1 }
 0x194   : > { %v1185_v4 = vpop.eup %1184  ;;  %v1674_v5 = vsel %vm620_vm6, %v621_v2, %v619_v3 }
 0x195   : > { %v624_v6 = vmul.f32 %v1185_v4, %v608_v57  ;;  %v631_v7 = vadd.f32 1e-10, %v1674_v5 }
 0x197   : > { %v626_v9 = vsel %vm625_vm7, %v608_v57, %v624_v6  ;;  %1188 = vrcp.f32 %v631_v7 }
 0x198   : > { %v1677_v10 = vsel %vm627_vm8, %v628_v8, %v626_v9 }
 0x199   : > { %v632_v11 = vadd.f32 1e-10, %v1677_v10 }
 0x19b   : > { %1190 = vrcp.f32 %v632_v11 }
 0x19d   : > { %v1187_v12 = vpop.eup %1186 }
 0x1a1   : > { %v1189_v17 = vpop.eup %1188 }
 0x1a5   : > { %v1191_v26 = vpop.eup %1190 }
 0x1f7   : > { %v1680_v13 = vpop.xlane.xlu1 %581 }
 0x1f8   : > { %v634_v14 = vmul.f32 %v1187_v12, %v1680_v13 }
 0x1f9   : > { %v1684_v25 = vpop.xlane.xlu0 %583 }
 0x1fa   : > { %v639_v15 = vmul.f32 %v634_v14, %v634_v14  ;;  %v994_v16 = vclamps-f32 %v634_v14, 0.9999999  ;;  %v636_v30 = vmul.f32 %v1189_v17, %v1684_v25 }
 0x1fb   : > { %v1690_v40 = vpop.xlane.xlu1 %585 }
 0x1fc   : > { %v642_v18 = vsub.f32 1.0, %v639_v15  ;;  %v645_v19 = vmul.f32 %v639_v15, %v634_v14  ;;  %v654_v20 = vmul.f32 -6.0, %v639_v15  ;;  %vm675_vm9 = vcmp.le.f32.partialorder %v994_v16, 0.70710677 }
 0x1fd   : > { %v997_v21 = vsel %vm675_vm9, 1.0, %v1366_v35  ;;  %vm693_vm10 = vcmp.le.f32.partialorder %v994_v16, 6.123234e-17  ;;  %vm714_vm11 = vcmp.le.f32.partialorder %v994_v16, -0.70710677  ;;  %vm735_vm12 = vcmp.le.f32.partialorder %v994_v16, -1.0 }
 0x1fe   : > { %v648_v22 = vmul.f32 %v645_v19, %v634_v14  ;;  %v657_v23 = vmul.f32 %v654_v20, %v642_v18  ;;  %v687_v24 = vmul.f32 2.0, %v997_v21  ;;  %v1000_v27 = vsel %vm693_vm10, 1.0, %v1366_v35 }
 0x1ff   : > { %v1003_v28 = vsel %vm714_vm11, 1.0, %v1366_v35  ;;  %v1006_v29 = vsel %vm735_vm12, 1.0, %v1366_v35  ;;  %v702_v36 = vadd.f32 %v1000_v27, %v997_v21  ;;  %v705_v37 = vmul.f32 2.0, %v1000_v27 }
 0x200   : > { %v690_v33 = vsub.f32 1.0, %v687_v24  ;;  %v726_v41 = vmul.f32 2.0, %v1003_v28  ;;  %v747_v43 = vmul.f32 2.0, %v1006_v29  ;;  %v638_v44 = vmul.f32 %v1191_v26, %v1690_v40 }
 0x201   : > { %v708_v45 = vsub.f32 1.0, %v705_v37  ;;  %v723_v46 = vadd.f32 %v1003_v28, %v702_v36  ;;  %v660_v48 = vadd.f32 %v657_v23, %v648_v22  ;;  %v640_v51 = vmul.f32 %v636_v30, %v636_v30 }
 0x202   : > { %v641_v49 = vmul.f32 %v638_v44, %v638_v44  ;;  %v996_v50 = vclamps-f32 %v638_v44, 0.9999999  ;;  %v663_v52 = vmul.f32 %v642_v18, %v642_v18  ;;  %v729_v54 = vsub.f32 1.0, %v726_v41 }
 0x203   : > { %v711_v53 = vmul.f32 %v708_v45, %v690_v33  ;;  %v750_v55 = vsub.f32 1.0, %v747_v43  ;;  %v744_v56 = vadd.f32 %v1006_v29, %v723_v46  ;;  %v646_v1 = vmul.f32 %v640_v51, %v636_v30 }
 0x204   : > { %v644_v57 = vsub.f32 1.0, %v641_v49  ;;  %v647_v58 = vmul.f32 %v641_v49, %v638_v44  ;;  %vm677_vm13 = vcmp.le.f32.partialorder %v996_v50, 0.70710677  ;;  %v656_v60 = vmul.f32 -6.0, %v641_v49 }
 0x205   : > { %v732_v59 = vmul.f32 %v729_v54, %v711_v53  ;;  %v999_v61 = vsel %vm677_vm13, 1.0, %v1366_v35  ;;  %vm695_vm14 = vcmp.le.f32.partialorder %v996_v50, 6.123234e-17  ;;  %v666_v62 = vadd.f32 %v663_v52, %v660_v48 }
 0x206   : > { %v689_v0 = vmul.f32 2.0, %v999_v61  ;;  %v995_v2 = vclamps-f32 %v636_v30, 0.9999999  ;;  %v1002_v4 = vsel %vm695_vm14, 1.0, %v1366_v35  ;;  %vm716_vm15 = vcmp.le.f32.partialorder %v996_v50, -0.70710677 }
 0x207   : > { %v753_v3 = vmul.f32 %v750_v55, %v732_v59  ;;  %vm737_vm3 = vcmp.le.f32.partialorder %v996_v50, -1.0  ;;  %v759_v6 = vmul.f32 2.0, %v744_v56  ;;  %v650_v7 = vmul.f32 %v647_v58, %v638_v44 }
 0x208   : > { %v692_v8 = vsub.f32 1.0, %v689_v0  ;;  %v707_v9 = vmul.f32 2.0, %v1002_v4  ;;  %v659_v12 = vmul.f32 %v656_v60, %v644_v57  ;;  %v1005_v14 = vsel %vm716_vm15, 1.0, %v1366_v35 }
 0x209   : > { %v756_v11 = vmul.f32 %v753_v3, %v666_v62  ;;  %v1008_v15 = vsel %vm737_vm3, 1.0, %v1366_v35  ;;  %v768_v16 = vmul.f32 100.0, %v1680_v13  ;;  %v704_v17 = vadd.f32 %v1002_v4, %v999_v61 }
 0x20a   : > { %v710_v18 = vsub.f32 1.0, %v707_v9  ;;  %v728_v19 = vmul.f32 2.0, %v1005_v14  ;;  %v665_v21 = vmul.f32 %v644_v57, %v644_v57  ;;  %v749_v22 = vmul.f32 2.0, %v1008_v15 }
 0x20b   : > { %v762_v20 = vsub.f32 %v756_v11, %v759_v6  ;;  %v643_v23 = vsub.f32 1.0, %v640_v51  ;;  %v655_v27 = vmul.f32 -6.0, %v640_v51  ;;  %vm676_vm4 = vcmp.le.f32.partialorder %v995_v2, 0.70710677 }
 0x20c   : > { %v713_v24 = vmul.f32 %v710_v18, %v692_v8  ;;  %v731_v26 = vsub.f32 1.0, %v728_v19  ;;  %v662_v29 = vadd.f32 %v659_v12, %v650_v7  ;;  %v649_v33 = vmul.f32 %v646_v1, %v636_v30 }
 0x20d   : > { %v765_v28 = vmul.f32 %v762_v20, %v1671_v63  ;;  %v998_v36 = vsel %vm676_vm4, 1.0, %v1366_v35  ;;  %v725_v37 = vadd.f32 %v1005_v14, %v704_v17  ;;  %vm694_vm5 = vcmp.le.f32.partialorder %v995_v2, 6.123234e-17 }
 0x20e   : > { %v734_v41 = vmul.f32 %v731_v26, %v713_v24  ;;  %v688_v13 = vmul.f32 2.0, %v998_v36  ;;  %v752_v44 = vsub.f32 1.0, %v749_v22  ;;  %v1001_v45 = vsel %vm694_vm5, 1.0, %v1366_v35 }
 0x20f   : > { %v771_v43 = vadd.f32 %v768_v16, %v765_v28  ;;  %vm715_vm6 = vcmp.le.f32.partialorder %v995_v2, -0.70710677  ;;  %v658_v46 = vmul.f32 %v655_v27, %v643_v23  ;;  %v703_v49 = vadd.f32 %v1001_v45, %v998_v36 }
 0x210   : > { %v691_v48 = vsub.f32 1.0, %v688_v13  ;;  %v706_v50 = vmul.f32 2.0, %v1001_v45  ;;  %v755_v51 = vmul.f32 %v752_v44, %v734_v41  ;;  %v1004_v63 = vsel %vm715_vm6, 1.0, %v1366_v35 }
 0x211   : > { %vm736_vm7 = vcmp.le.f32.partialorder %v995_v2, -1.0  ;;  %v774_v30 = vmul.f32 0.00990099, %v771_v43  ;;  %v727_v53 = vmul.f32 2.0, %v1004_v63  ;;  %v668_v54 = vadd.f32 %v665_v21, %v662_v29 }
 0x212   : > { %v709_v52 = vsub.f32 1.0, %v706_v50  ;;  %v746_v55 = vadd.f32 %v1008_v15, %v725_v37  ;;  %v724_v56 = vadd.f32 %v1004_v63, %v703_v49  ;;  %v1007_v57 = vsel %vm736_vm7, 1.0, %v1366_v35 }
 0x213   : > { %779 = vperm.xlu0 %1178, %v774_v30   ;;  %v730_v59 = vsub.f32 1.0, %v727_v53  ;;  %v758_v60 = vmul.f32 %v755_v51, %v668_v54  ;;  %v661_v61 = vadd.f32 %v658_v46, %v649_v33  ;;  %v748_v62 = vmul.f32 2.0, %v1007_v57 }
 0x214   : > { %v712_v58 = vmul.f32 %v709_v52, %v691_v48  ;;  %v761_v1 = vmul.f32 2.0, %v746_v55  ;;  %v664_v3 = vmul.f32 %v643_v23, %v643_v23  ;;  %v745_v4 = vadd.f32 %v1007_v57, %v724_v56 }
 0x215   : > { %v751_v6 = vsub.f32 1.0, %v748_v62  ;;  %v770_v14 = vmul.f32 100.0, %v1690_v40  ;;  %v769_v16 = vmul.f32 100.0, %v1684_v25 }
 0x216   : > { %v733_v0 = vmul.f32 %v730_v59, %v712_v58  ;;  %v764_v2 = vsub.f32 %v758_v60, %v761_v1  ;;  %v667_v7 = vadd.f32 %v664_v3, %v661_v61  ;;  %v760_v11 = vmul.f32 2.0, %v745_v4 }
 0x218   : > { %v754_v8 = vmul.f32 %v751_v6, %v733_v0  ;;  %v767_v12 = vmul.f32 %v764_v2, %v1677_v10 }
 0x21a   : > { %v757_v9 = vmul.f32 %v754_v8, %v667_v7  ;;  %v773_v17 = vadd.f32 %v770_v14, %v767_v12 }
 0x21c   : > { %v763_v35 = vsub.f32 %v757_v9, %v760_v11  ;;  %v776_v20 = vmul.f32 0.00990099, %v773_v17 }
 0x21e   : > { %v766_v15 = vmul.f32 %v763_v35, %v1674_v5 }
 0x220   : > { %v772_v18 = vadd.f32 %v769_v16, %v766_v15 }
 0x222   : > { %v775_v19 = vmul.f32 0.00990099, %v772_v18 }
 0x224   : > { %784 = vperm.xlu1 %1179, %v775_v19  }
 0x228   : > { %789 = vperm.xlu1 %1179, %v776_v20  }
 0x292   : > { %v780_v21 = vpop.permute.xlu0 %779 }
 0x293   : > { %v792_v10 = vsel %vm569_vm0, %v780_v21, %v1643_v39 }
 0x294   : > { %795 = vst [vmem:[%s1595_s6] sm:$0xff] %v792_v10 }
 0x2a3   : > { %v785_v22 = vpop.permute.xlu1 %784 }
 0x2a4   : > { %v793_v5 = vsel %vm570_vm2, %v785_v22, %v1659_v47 }
 0x2a5   : > { %796 = vst [vmem:[%s1595_s6 + $0x8] sm:$0xff] %v793_v5 }
 0x2a7   : > { %v790_v25 = vpop.permute.xlu1 %789 }
 0x2a8   : > { %v794_v40 = vsel %vm571_vm1, %v790_v25, %v1655_v42 }
 0x2a9   : > { %797 = vst [vmem:[%s1595_s6 + $0x10] sm:$0xff] %v794_v40 }
 0x2aa PF: > { %s1833_s7 = sld [smem:[#allocation17_spill]]  ;;  %s814_s25 = sshll.u32 %s1595_s6, 4  ;;  %s1730_s25 = int_to_ptr.vmem [resolvable:$true] %s814_s25 }
 0x2ab   : > { %s1734_s26 = scalar_lea.sflag [#allocation6], %s382_s24  ;;  %s1220_s16 = scalar_lea.vmem %s1730_s25, 384 }
 0x2ac   : > { %p1221_p5 = scmp.ne.s32.totalorder %s1730_s25, %s1220_s16  ;;  %p1834_p1 = scmp.ne.s32.totalorder %s1831_s21, 0 }
 0x2ad   : > { %s1367_s27 = smov [#allocation7]  }
 0x2ae   : > { %p1222_p2 = pnand %p1221_p5, %p1834_p1  ;;  %s1224_s9 = sshll.u32 %s1367_s27, 4  ;;  %s1225_s9 = int_to_ptr.vmem [resolvable:$false] %s1224_s9 }
 0x2af   : > { %s1226_s14 = scalar_lea.vmem %s1225_s9, 768  ;;  %p1227_p3 = scmp.lt.s32.totalorder %s1730_s25, %s1225_s9 }
 0x2b0   : > { %s1727_s15 = scalar_lea.hbm %s1833_s7, %s977_s17  ;;  %p1223_p6 = pneg %p1222_p2 }
 0x2b1   : > { %p1228_p8 = scmp.lt.s32.totalorder %s1226_s14, %s1220_s16 }
 0x2b3   : > { %p1229_p10 = por %p1228_p8, %p1227_p3 }
 0x2b5   : > { %p1230_p11 = pnand %p1229_p10, %p1223_p6 }
 0x2b7   : > { %1233 = shalt.err (!%p1230_p11)
}
 0x2b8   : > { %s1234_s24 = scalar_lea.hbm %s1727_s15, 384  ;;  %s1238_s13 = scalar_lea.hbm %s1833_s7, 768 }
 0x2b9   : > { %p1235_p9 = scmp.ne.s32.totalorder %s1727_s15, %s1234_s24  ;;  %p1239_p7 = scmp.lt.u32.totalorder %s1727_s15, %s1833_s7 }
 0x2ba   : > { %p1240_p12 = scmp.lt.u32.totalorder %s1238_s13, %s1234_s24  ;;  %p1242_p5 = scmp.lt.u32.totalorder %s1234_s24, %s1727_s15 }
 0x2bb   : > { %p1236_p13 = pnand %p1235_p9, %p1834_p1 }
 0x2bc   : > { %p1241_p4 = por %p1240_p12, %p1239_p7 }
 0x2bd   : > { %p1237_p0 = pneg %p1236_p13 }
 0x2be   : > { %p1243_p2 = por %p1242_p5, %p1241_p4 }
 0x2c0   : > { %p1244_p6 = pnand %p1243_p2, %p1237_p0 }
 0x2c2   : > { %1247 = shalt.err (!%p1244_p6)
}
 0x2c3   : > { %s1368_s5 = smov 128   ;;  %s1369_s10 = smov 256  }
 0x2c4   : > { %s1370_s12 = smov 8  }
 0x2c5   : > { %1048 = dma.vmem_to_hbm [thread:$0]  (%p1834_p1), %s1730_s25, 384, %s1727_s15, %s1734_s26, %s1368_s5, %s1369_s10, %s1370_s12  }
 0x2c6 PF: > { %p1054_p3 = scmp.ge.s32.totalorder %s1358_s30, 2  ;;  %s829_s16 = sand.u32 1, %s1310_s18  }
 0x2c7   : > { %p1835_p8 = scmp.ne.s32.totalorder %s1832_s11, 0  ;;  %s830_s27 = scalar_lea.sflag [#allocation6], %s829_s16 }
 0x2c9   : > { %p1051_p10 = pnand %p1054_p3, %p1835_p8 }
 0x2cb   : > { %1305 = dma.done.wait (!%p1051_p10), %s830_s27, 384  }
 0x2cc   : > { %1307 = vsyncadd (!%p1051_p10), %s830_s27, 4294966912  ;;  %s21_s30 = sadd.s32 1, %s1358_s30   ;;  %s1837_s21 = sld [smem:[#allocation10_spill]] }
 0x2cd   : > { %p1763_p11 = scmp.ge.s32.totalorder %s21_s30, 8   ;;  %s1838_s20 = sld [smem:[#allocation16_spill]] }
 0x2ce   : > { %s1839_s15 = sld [smem:[#allocation15_spill]]  ;;  %s1840_s24 = sld [smem:[#allocation11_spill]] }
 0x2cf   : > { %s1841_s25 = sld [smem:[#allocation14_spill]]  ;;  %s1842_s11 = sld [smem:[#allocation12_spill]] }
 0x2d0   : > { %s1843_s14 = sld [smem:[#allocation13_spill]]  ;;  %s1844_s18 = smov %s1314_s19 }
 0x2d1   : > { %s1849_s26 = smov %s1350_s28  ;;  %s1850_s27 = smov %s1354_s29 }
 0x2d2   : > { %s1845_s19 = smov %s1837_s21  ;;  %s1846_s21 = smov %s1326_s22 }
 0x2d3   : > { %s1847_s22 = smov %s1330_s23  ;;  %20 = sbr.rel (!%p1763_p11) target bundleno = 12 (0xc), region = 151 }
 0x2d4   : > { %s1848_s23 = smov %s1839_s15 }
 0x2d5   : > { %s1851_s28 = smov %s1842_s11 }
 0x2d6   : > { %s1852_s29 = smov %s1843_s14 }
 0x2da   :  { %835 = vsyncpa [#allocation5], 1 }
 0x2db   :  { %837 = vsyncpa [#allocation5 + $0x1], 1 }
 0x2dc   :  { %838 = vsyncpa [#allocation6], 1 }
 0x2dd   :  { %840 = vsyncpa [#allocation6 + $0x1], 1 }

</bundles_post_ra>
